<compile_context>
chip_gen: v7x
topology: tpu7x:2x2x1
jax: 0.10.0
libtpu: 0.0.40
codegen_flags: <defaults>
</compile_context>

<pallas_src>
import functools

import jax
import jax.numpy as jnp
from jax.experimental import pallas as pl
from jax.experimental.pallas import tpu as pltpu

LANE = 128            # padded hidden & action width (one full vreg of lanes)
NEG_PAD = -1e30       # f32 bias for padded action columns -> exp underflows to 0
SINGLE_TILE_MAX = 1024  # up to this many rows, run the whole batch in one grid step
BIG_TILE = 512        # per-step rows for large rollout batches (megacore-friendly)


def policy_kernel(x_ref, w1_ref, b1_ref, w2_ref, b2_ref, out_ref):
    # fc1 -> ReLU (lane-dense: hidden padded to 128 lanes).
    x = x_ref[...]                                                    # (tile_b, K)
    h = jnp.dot(x, w1_ref[...], preferred_element_type=jnp.float32)
    h = jnp.maximum(h + b1_ref[...], 0.0)                             # (tile_b, 128)

    # fc2 (padded action columns get logit ~ -1e30 from the padded bias).
    logits = jnp.dot(h, w2_ref[...], preferred_element_type=jnp.float32)
    logits = logits + b2_ref[...]                                     # (tile_b, 128)

    # Numerically stable softmax over the (padded) action axis; padded lanes
    # contribute exactly 0 to the sum.  Exact division: kernel is overhead-bound,
    # so the approximate-EUP reciprocal buys nothing and only adds bias.
    m = jnp.max(logits, axis=-1, keepdims=True)
    e = jnp.exp(logits - m)
    s = jnp.sum(e, axis=-1, keepdims=True)
    out_ref[...] = e / s                                              # lane-dense store


def pad_params(w1, b1, w2, b2):
    """Pad parameters to 128 lanes ONCE (hoisted off the per-call path).
    w1: (num_inputs, H); b1: (H,) or (1,H); w2: (H, num_actions); b2 likewise."""
    num_inputs, hidden = w1.shape
    num_actions = w2.shape[1]
    w1_p = jnp.zeros((num_inputs, LANE), jnp.float32).at[:, :hidden].set(w1)
    b1_p = jnp.zeros((1, LANE), jnp.float32).at[:, :hidden].set(
        jnp.asarray(b1, jnp.float32).reshape(1, -1))
    w2_p = jnp.zeros((LANE, LANE), jnp.float32).at[:hidden, :num_actions].set(w2)
    # NOTE: -1e30 is correct in f32; would become -inf under a bf16 cast (still
    # exp()->0, but keep this in mind if dtypes ever change).
    b2_p = jnp.full((1, LANE), NEG_PAD, jnp.float32).at[:, :num_actions].set(
        jnp.asarray(b2, jnp.float32).reshape(1, -1))
    return w1_p, b1_p, w2_p, b2_p


@functools.partial(jax.jit, static_argnames=("num_actions",))
def policy_forward(state, w1_p, b1_p, w2_p, b2_p, *, num_actions):
    """state: (B, num_inputs) f32; padded params from pad_params().
    Returns softmax action probabilities of shape (B, num_actions)."""
    B, num_inputs = state.shape
    h_pad = w1_p.shape[1]
    a_pad = w2_p.shape[1]

    # Single grid step for small batches (no per-step overhead, no batch padding);
    # 512-row tiles + "parallel" semantics for large rollout batches (v7x 2-TC).
    if B <= SINGLE_TILE_MAX:
        tile_b = B
    else:
        tile_b = BIG_TILE
    n_tiles = pl.cdiv(B, tile_b)
    b_padded = n_tiles * tile_b
    state_in = state
    if b_padded != B:  # only for large, ragged batches
        state_in = jnp.zeros((b_padded, num_inputs), state.dtype).at[:B].set(state)

    cost = pl.CostEstimate(
        flops=2 * b_padded * num_inputs * h_pad + 2 * b_padded * h_pad * a_pad,
        transcendentals=b_padded * a_pad,                 # exp per (row, lane)
        bytes_accessed=4 * (state_in.size + w1_p.size + b1_p.size
                            + w2_p.size + b2_p.size + b_padded * a_pad),
    )

    out = pl.pallas_call(
        policy_kernel,
        out_shape=jax.ShapeDtypeStruct((b_padded, a_pad), jnp.float32),
        grid=(n_tiles,),
        in_specs=[
            # Only the state is tiled over the batch grid.
            pl.BlockSpec((tile_b, num_inputs), lambda i: (i, 0)),
            # Weights/biases: same block every step -> DMA'd once, VMEM-resident.
            pl.BlockSpec((num_inputs, h_pad), lambda i: (0, 0)),
            pl.BlockSpec((1, h_pad), lambda i: (0, 0)),
            pl.BlockSpec((h_pad, a_pad), lambda i: (0, 0)),
            pl.BlockSpec((1, a_pad), lambda i: (0, 0)),
        ],
        out_specs=pl.BlockSpec((tile_b, a_pad), lambda i: (i, 0)),
        compiler_params=pltpu.CompilerParams(
            dimension_semantics=("parallel",)),
        cost_estimate=cost,
    )(state_in, w1_p, b1_p, w2_p, b2_p)

    # Drop batch/action padding -> same shape/semantics as the PyTorch forward.
    return out[:B, :num_actions]


def init_params(key, num_inputs, num_actions, hidden_size):
    # Deterministic synthetic init (mimics nn.Linear uniform(-1/sqrt(fan_in), +)).
    k1, k2, k3, k4 = jax.random.split(key, 4)
    lim1 = 1.0 / jnp.sqrt(jnp.float32(num_inputs))
    lim2 = 1.0 / jnp.sqrt(jnp.float32(hidden_size))
    # Stored pre-transposed: (in, out) so the kernel does x @ W directly.
    w1 = jax.random.uniform(k1, (num_inputs, hidden_size), jnp.float32, -lim1, lim1)
    b1 = jax.random.uniform(k2, (1, hidden_size), jnp.float32, -lim1, lim1)
    w2 = jax.random.uniform(k3, (hidden_size, num_actions), jnp.float32, -lim2, lim2)
    b2 = jax.random.uniform(k4, (1, num_actions), jnp.float32, -lim2, lim2)
    return w1, b1, w2, b2


if __name__ == "__main__":
    # CartPole shapes: 4 state features, 2 actions, hidden=24, batch of 256 states.
    num_inputs, num_actions, hidden_size, batch = 4, 2, 24, 256

    key = jax.random.PRNGKey(0)
    k_params, k_state = jax.random.split(key)
    w1, b1, w2, b2 = init_params(k_params, num_inputs, num_actions, hidden_size)
    state = jax.random.normal(k_state, (batch, num_inputs), jnp.float32)

    # Pad parameters once (outside the per-call path).
    w1_p, b1_p, w2_p, b2_p = pad_params(w1, b1, w2, b2)

    probs = policy_forward(state, w1_p, b1_p, w2_p, b2_p, num_actions=num_actions)
    jax.block_until_ready(probs)

    # Sanity check vs pure-JAX reference.
    h_ref = jnp.maximum(state @ w1 + b1, 0.0)
    ref = jax.nn.softmax(h_ref @ w2 + b2, axis=1)
    assert probs.shape == (batch, num_actions)
    assert jnp.allclose(probs, ref, atol=1e-4, rtol=1e-4), "mismatch vs reference"
    assert jnp.allclose(jnp.sum(probs, axis=1), 1.0, atol=1e-5), "rows must sum to 1"

    print("KERNEL_OK")
</pallas_src>

<mosaic_0001>
module attributes {stable_mosaic.version = 11 : i64} {
  func.func @policy_kernel(%arg0: i32, %arg1: memref<256x4xf32, #tpu.memory_space<vmem>>, %arg2: memref<4x128xf32, #tpu.memory_space<vmem>>, %arg3: memref<1x128xf32, #tpu.memory_space<vmem>>, %arg4: memref<128x128xf32, #tpu.memory_space<vmem>>, %arg5: memref<1x128xf32, #tpu.memory_space<vmem>>, %arg6: memref<256x128xf32, #tpu.memory_space<vmem>>) attributes {dimension_semantics = [#tpu.dimension_semantics<parallel>], iteration_bounds = array<i64: 1>, scalar_prefetch = 0 : i64, scratch_operands = 0 : i64, tpu.core_type = #tpu.core_type<tc>, window_params = [{transform_indices = @transform_0, window_bounds = array<i64: 256, 4>}, {pipeline_mode = #tpu.pipeline_mode<synchronous>, transform_indices = @transform_1, window_bounds = array<i64: 4, 128>}, {pipeline_mode = #tpu.pipeline_mode<synchronous>, transform_indices = @transform_2, window_bounds = array<i64: 1, 128>}, {pipeline_mode = #tpu.pipeline_mode<synchronous>, transform_indices = @transform_3, window_bounds = array<i64: 128, 128>}, {pipeline_mode = #tpu.pipeline_mode<synchronous>, transform_indices = @transform_4, window_bounds = array<i64: 1, 128>}, {transform_indices = @transform_5, window_bounds = array<i64: 256, 128>}]} {
    %c0 = arith.constant 0 : index
    %c0_0 = arith.constant 0 : index
    %0 = vector.load %arg1[%c0, %c0_0] : memref<256x4xf32, #tpu.memory_space<vmem>>, vector<256x4xf32>
    %c0_1 = arith.constant 0 : index
    %c0_2 = arith.constant 0 : index
    %1 = vector.load %arg2[%c0_1, %c0_2] : memref<4x128xf32, #tpu.memory_space<vmem>>, vector<4x128xf32>
    %cst = arith.constant dense<0.000000e+00> : vector<256x128xf32>
    %2 = tpu.matmul %0, %1, %cst {dimension_numbers = #tpu.dot_dimension_numbers<[1], [0], [0], [1], [0, 0, 1, 1], [], []>} : vector<256x4xf32>, vector<4x128xf32>, vector<256x128xf32> -> vector<256x128xf32>
    %c0_3 = arith.constant 0 : index
    %c0_4 = arith.constant 0 : index
    %3 = vector.load %arg3[%c0_3, %c0_4] : memref<1x128xf32, #tpu.memory_space<vmem>>, vector<1x128xf32>
    %4 = vector.broadcast %3 : vector<1x128xf32> to vector<256x128xf32>
    %5 = arith.addf %2, %4 : vector<256x128xf32>
    %cst_5 = arith.constant 0.000000e+00 : f32
    %6 = vector.broadcast %cst_5 : f32 to vector<256x128xf32>
    %7 = arith.maximumf %5, %6 : vector<256x128xf32>
    %c0_6 = arith.constant 0 : index
    %c0_7 = arith.constant 0 : index
    %8 = vector.load %arg4[%c0_6, %c0_7] : memref<128x128xf32, #tpu.memory_space<vmem>>, vector<128x128xf32>
    %cst_8 = arith.constant dense<0.000000e+00> : vector<256x128xf32>
    %9 = tpu.matmul %7, %8, %cst_8 {dimension_numbers = #tpu.dot_dimension_numbers<[1], [0], [0], [1], [0, 0, 1, 1], [], []>} : vector<256x128xf32>, vector<128x128xf32>, vector<256x128xf32> -> vector<256x128xf32>
    %c0_9 = arith.constant 0 : index
    %c0_10 = arith.constant 0 : index
    %10 = vector.load %arg5[%c0_9, %c0_10] : memref<1x128xf32, #tpu.memory_space<vmem>>, vector<1x128xf32>
    %11 = vector.broadcast %10 : vector<1x128xf32> to vector<256x128xf32>
    %12 = arith.addf %9, %11 : vector<256x128xf32>
    %cst_11 = arith.constant dense<0xFF800000> : vector<256xf32>
    %13 = vector.multi_reduction <maximumf>, %12, %cst_11 [1] : vector<256x128xf32> to vector<256xf32>
    %14 = vector.shape_cast %13 : vector<256xf32> to vector<256x1xf32>
    %15 = vector.broadcast %14 : vector<256x1xf32> to vector<256x128xf32>
    %16 = arith.subf %12, %15 : vector<256x128xf32>
    %17 = math.exp %16 : vector<256x128xf32>
    %cst_12 = arith.constant dense<0.000000e+00> : vector<256xf32>
    %18 = vector.multi_reduction <add>, %17, %cst_12 [1] : vector<256x128xf32> to vector<256xf32>
    %19 = vector.shape_cast %18 : vector<256xf32> to vector<256x1xf32>
    %20 = vector.broadcast %19 : vector<256x1xf32> to vector<256x128xf32>
    %21 = arith.divf %17, %20 : vector<256x128xf32>
    %c0_13 = arith.constant 0 : index
    %c0_14 = arith.constant 0 : index
    %22 = vector.load %arg6[%c0_13, %c0_14] : memref<256x128xf32, #tpu.memory_space<vmem>>, vector<256x128xf32>
    tpu.vector_store %arg6[%c0_13, %c0_14], %21 {strides = array<i32>} : memref<256x128xf32, #tpu.memory_space<vmem>>, vector<256x128xf32>,
    return
  }
  func.func @transform_0(%arg0: i32) -> (i32, i32) {
    %c0_i32 = arith.constant 0 : i32
    %c0_i32_0 = arith.constant 0 : i32
    return %arg0, %c0_i32 : i32, i32
  }
  func.func @transform_1(%arg0: i32) -> (i32, i32) {
    %c0_i32 = arith.constant 0 : i32
    %c0_i32_0 = arith.constant 0 : i32
    %c0_i32_1 = arith.constant 0 : i32
    return %c0_i32, %c0_i32_0 : i32, i32
  }
  func.func @transform_2(%arg0: i32) -> (i32, i32) {
    %c0_i32 = arith.constant 0 : i32
    %c0_i32_0 = arith.constant 0 : i32
    %c0_i32_1 = arith.constant 0 : i32
    return %c0_i32, %c0_i32_0 : i32, i32
  }
  func.func @transform_3(%arg0: i32) -> (i32, i32) {
    %c0_i32 = arith.constant 0 : i32
    %c0_i32_0 = arith.constant 0 : i32
    %c0_i32_1 = arith.constant 0 : i32
    return %c0_i32, %c0_i32_0 : i32, i32
  }
  func.func @transform_4(%arg0: i32) -> (i32, i32) {
    %c0_i32 = arith.constant 0 : i32
    %c0_i32_0 = arith.constant 0 : i32
    %c0_i32_1 = arith.constant 0 : i32
    return %c0_i32, %c0_i32_0 : i32, i32
  }
  func.func @transform_5(%arg0: i32) -> (i32, i32) {
    %c0_i32 = arith.constant 0 : i32
    %c0_i32_0 = arith.constant 0 : i32
    return %arg0, %c0_i32 : i32, i32
  }
}

</mosaic_0001>

<bundles_post_ra>
// kernel: policy_forward.1
= control target key start
LH: loop header
LB: loop body
LE: loop exit
PB: predicated region body
PF: predicated region fallthrough
CT: control target
= control target key end

     0   :  { %vm157_vm0 = vcmask 1043456   ;;  %vm60_vm1 = vcmask 31744   ;;  %s2047_s1 = inlined_call_operand.vmem [shape: f32[4,128], index: 1, kind: input, shape index: {}]   ;;  %s2048_s0 = inlined_call_operand.vmem [shape: f32[256,4], index: 0, kind: input, shape index: {}]   ;;  %s2049_s3 = inlined_call_operand.vmem [shape: f32[128,128], index: 3, kind: input, shape index: {}]   ;;  %s2050_s2 = inlined_call_operand.vmem [shape: f32[1,128], index: 2, kind: input, shape index: {}]   ;;  %s2051_s4 = inlined_call_operand.vmem [shape: f32[1,128], index: 4, kind: input, shape index: {}]   ;;  %s2052_s5 = inlined_call_operand.vmem [shape: f32[256,128], index: 5, kind: output, shape index: {}]  }
   0x1   :  { %v52_v0 = vld [vmem:[%s2047_s1] sm:$0xf]  ;;  %v21_v2 = vld [vmem:[%s2048_s0 + $0x8] sm:$0xff]  ;;  %v22_v3 = vld [vmem:[%s2048_s0 + $0x10] sm:$0xff] }
   0x2   :  { %v20_v1 = vld [vmem:[%s2048_s0] sm:$0xff]  ;;  %1106 = vmatprep.subr.msk.mxu0 %vm157_vm0, %v52_v0  ;;  %v23_v4 = vld [vmem:[%s2048_s0 + $0x18] sm:$0xff]  ;;  %v25_v6 = vld [vmem:[%s2048_s0 + $0x28] sm:$0xff] }
   0x3   :  { %1108 = vmatprep.mubr.msk.f32.mxu0 %vm60_vm1, %v20_v1  ;;  %1107 = vmatpush3.msk.msra.mxu0 %vm157_vm0, %v52_v0  ;;  %v24_v5 = vld [vmem:[%s2048_s0 + $0x20] sm:$0xff]  ;;  %v26_v7 = vld [vmem:[%s2048_s0 + $0x30] sm:$0xff]  ;;  %v419_v9 = vld [vmem:[%s2049_s3 + $0x8] sm:$0xff] }
   0x4   :  { %1109 = vmatmul.mubr.msk.f32.vlgmr.msra.gmra.mrb[0].mxu0 %vm60_vm1, %v21_v2  ;;  %v418_v8 = vld [vmem:[%s2049_s3] sm:$0xff]  ;;  %v420_v10 = vld [vmem:[%s2049_s3 + $0x10] sm:$0xff]  ;;  %v27_v11 = vld [vmem:[%s2048_s0 + $0x38] sm:$0xff] }
   0x5   :  { %1111 = vmatprep.mubr.msk.f32.mxu0 %vm60_vm1, %v22_v3  ;;  %v1236_v12 = vpack.c.bf16 %v419_v9, %v418_v8  ;;  %v421_v13 = vld [vmem:[%s2049_s3 + $0x18] sm:$0xff]  ;;  %v28_v14 = vld [vmem:[%s2048_s0 + $0x40] sm:$0xff]  ;;  %v423_v17 = vld [vmem:[%s2049_s3 + $0x28] sm:$0xff] }
   0x6   :  { %v1240_v15 = vpack.c.bf16 %v421_v13, %v420_v10  ;;  %v422_v16 = vld [vmem:[%s2049_s3 + $0x20] sm:$0xff]  ;;  %v29_v18 = vld [vmem:[%s2048_s0 + $0x48] sm:$0xff]  ;;  %v30_v19 = vld [vmem:[%s2048_s0 + $0x50] sm:$0xff] }
   0x7   :  { %1237 = vmatprep.subr.bf16.mxu0 %v1236_v12  ;;  %1268 = vmatprep.subr.bf16.mxu1 %v1236_v12  ;;  %v1244_v20 = vpack.c.bf16 %v423_v17, %v422_v16  ;;  %v424_v21 = vld [vmem:[%s2049_s3 + $0x30] sm:$0xff]  ;;  %v425_v22 = vld [vmem:[%s2049_s3 + $0x38] sm:$0xff]  ;;  %v32_v24 = vld [vmem:[%s2048_s0 + $0x60] sm:$0xff] }
   0x8   :  { %1112 = vmatmul.mubr.msk.f32.gmra.mrb[2].mxu0 %vm60_vm1, %v23_v4  ;;  %1276 = vmatpush3.bf16.msra.mxu1 %v1236_v12  ;;  %v31_v23 = vld [vmem:[%s2048_s0 + $0x58] sm:$0xff]  ;;  %v1248_v25 = vpack.c.bf16 %v425_v22, %v424_v21  ;;  %v426_v26 = vld [vmem:[%s2049_s3 + $0x40] sm:$0xff]  ;;  %v427_v27 = vld [vmem:[%s2049_s3 + $0x48] sm:$0xff] }
   0x9   :  { %1114 = vmatprep.mubr.msk.f32.mxu0 %vm60_vm1, %v24_v5  ;;  %1239 = vmatpush3.bf16.msra.mxu0 %v1236_v12  ;;  %v33_v28 = vld [vmem:[%s2048_s0 + $0x68] sm:$0xff]  ;;  %v34_v29 = vld [vmem:[%s2048_s0 + $0x70] sm:$0xff]  ;;  %v1252_v30 = vpack.c.bf16 %v427_v27, %v426_v26  ;;  %v429_v32 = vld [vmem:[%s2049_s3 + $0x58] sm:$0xff] }
   0xa   :  { %1241 = vmatprep.subr.bf16.mxu0 %v1240_v15  ;;  %1269 = vmatprep.subr.bf16.mxu1 %v1240_v15  ;;  %v428_v31 = vld [vmem:[%s2049_s3 + $0x50] sm:$0xff]  ;;  %v35_v33 = vld [vmem:[%s2048_s0 + $0x78] sm:$0xff]  ;;  %v36_v34 = vld [vmem:[%s2048_s0 + $0x80] sm:$0xff] }
   0xb   :  { %v1256_v35 = vpack.c.bf16 %v429_v32, %v428_v31  ;;  %v430_v36 = vld [vmem:[%s2049_s3 + $0x60] sm:$0xff]  ;;  %v431_v37 = vld [vmem:[%s2049_s3 + $0x68] sm:$0xff]  ;;  %v38_v39 = vld [vmem:[%s2048_s0 + $0x90] sm:$0xff] }
   0xc   :  { %1115 = vmatmul.mubr.msk.f32.gmra.mrb[4].mxu0 %vm60_vm1, %v25_v6  ;;  %1277 = vmatpush3.bf16.msra.mxu1 %v1240_v15  ;;  %v37_v38 = vld [vmem:[%s2048_s0 + $0x88] sm:$0xff]  ;;  %v1260_v40 = vpack.c.bf16 %v431_v37, %v430_v36  ;;  %v432_v41 = vld [vmem:[%s2049_s3 + $0x70] sm:$0xff]  ;;  %v433_v42 = vld [vmem:[%s2049_s3 + $0x78] sm:$0xff] }
   0xd   :  { %1117 = vmatprep.mubr.msk.f32.mxu0 %vm60_vm1, %v26_v7  ;;  %1243 = vmatpush3.bf16.msra.mxu0 %v1240_v15  ;;  %v39_v43 = vld [vmem:[%s2048_s0 + $0x98] sm:$0xff]  ;;  %v40_v44 = vld [vmem:[%s2048_s0 + $0xa0] sm:$0xff]  ;;  %v1264_v45 = vpack.c.bf16 %v433_v42, %v432_v41  ;;  %v41_v46 = vld [vmem:[%s2048_s0 + $0xa8] sm:$0xff] }
   0xe   :  { %1245 = vmatprep.subr.bf16.mxu0 %v1244_v20  ;;  %1270 = vmatprep.subr.bf16.mxu1 %v1244_v20  ;;  %v42_v47 = vld [vmem:[%s2048_s0 + $0xb0] sm:$0xff]  ;;  %v43_v48 = vld [vmem:[%s2048_s0 + $0xb8] sm:$0xff]  ;;  %v44_v49 = vld [vmem:[%s2048_s0 + $0xc0] sm:$0xff] }
   0xf   :  { %v45_v50 = vld [vmem:[%s2048_s0 + $0xc8] sm:$0xff]  ;;  %v46_v51 = vld [vmem:[%s2048_s0 + $0xd0] sm:$0xff]  ;;  %v47_v52 = vld [vmem:[%s2048_s0 + $0xd8] sm:$0xff] }
  0x10   :  { %1118 = vmatmul.mubr.msk.f32.gmra.mrb[6].mxu0 %vm60_vm1, %v27_v11  ;;  %1278 = vmatpush3.bf16.msra.mxu1 %v1244_v20  ;;  %v48_v53 = vld [vmem:[%s2048_s0 + $0xe0] sm:$0xff]  ;;  %v49_v54 = vld [vmem:[%s2048_s0 + $0xe8] sm:$0xff]  ;;  %v50_v55 = vld [vmem:[%s2048_s0 + $0xf0] sm:$0xff] }
  0x11   :  { %1120 = vmatprep.mubr.msk.f32.mxu0 %vm60_vm1, %v28_v14  ;;  %1247 = vmatpush3.bf16.msra.mxu0 %v1244_v20  ;;  %v51_v56 = vld [vmem:[%s2048_s0 + $0xf8] sm:$0xff]  ;;  %v1624_v57 = vld [vmem:[%s2050_s2] ss:$0 sm:$0xff] }
  0x12   :  { %1249 = vmatprep.subr.bf16.mxu0 %v1248_v25  ;;  %1271 = vmatprep.subr.bf16.mxu1 %v1248_v25 }
  0x14   :  { %1121 = vmatmul.mubr.msk.f32.gmra.mrb[8].mxu0 %vm60_vm1, %v29_v18  ;;  %1279 = vmatpush3.bf16.msra.mxu1 %v1248_v25 }
  0x15   :  { %1123 = vmatprep.mubr.msk.f32.mxu0 %vm60_vm1, %v30_v19  ;;  %1251 = vmatpush3.bf16.msra.mxu0 %v1248_v25 }
  0x16   :  { %1253 = vmatprep.subr.bf16.mxu0 %v1252_v30  ;;  %1272 = vmatprep.subr.bf16.mxu1 %v1252_v30 }
  0x18   :  { %1124 = vmatmul.mubr.msk.f32.gmra.mrb[10].mxu0 %vm60_vm1, %v31_v23  ;;  %1280 = vmatpush3.bf16.msra.mxu1 %v1252_v30 }
  0x19   :  { %1126 = vmatprep.mubr.msk.f32.mxu0 %vm60_vm1, %v32_v24  ;;  %1255 = vmatpush3.bf16.msra.mxu0 %v1252_v30 }
  0x1a   :  { %1257 = vmatprep.subr.bf16.mxu0 %v1256_v35  ;;  %1273 = vmatprep.subr.bf16.mxu1 %v1256_v35 }
  0x1c   :  { %1127 = vmatmul.mubr.msk.f32.gmra.mrb[12].mxu0 %vm60_vm1, %v33_v28  ;;  %1281 = vmatpush3.bf16.msra.mxu1 %v1256_v35 }
  0x1d   :  { %1129 = vmatprep.mubr.msk.f32.mxu0 %vm60_vm1, %v34_v29  ;;  %1259 = vmatpush3.bf16.msra.mxu0 %v1256_v35 }
  0x1e   :  { %1261 = vmatprep.subr.bf16.mxu0 %v1260_v40  ;;  %1274 = vmatprep.subr.bf16.mxu1 %v1260_v40 }
  0x20   :  { %1130 = vmatmul.mubr.msk.f32.gmra.mrb[14].mxu0 %vm60_vm1, %v35_v33  ;;  %1282 = vmatpush3.bf16.msra.mxu1 %v1260_v40 }
  0x21   :  { %1132 = vmatprep.mubr.msk.f32.mxu0 %vm60_vm1, %v36_v34  ;;  %1263 = vmatpush3.bf16.msra.mxu0 %v1260_v40 }
  0x22   :  { %1265 = vmatprep.subr.bf16.mxu0 %v1264_v45  ;;  %1275 = vmatprep.subr.bf16.mxu1 %v1264_v45 }
  0x24   :  { %1133 = vmatmul.mubr.msk.f32.gmra.mrb[16].mxu0 %vm60_vm1, %v37_v38  ;;  %1283 = vmatpush3.bf16.msra.mxu1 %v1264_v45 }
  0x25   :  { %1135 = vmatprep.mubr.msk.f32.mxu0 %vm60_vm1, %v38_v39  ;;  %1267 = vmatpush3.bf16.msra.mxu0 %v1264_v45 }
  0x28   :  { %1136 = vmatmul.mubr.msk.f32.gmra.mrb[18].mxu0 %vm60_vm1, %v39_v43 }
  0x29   :  { %1138 = vmatprep.mubr.msk.f32.mxu0 %vm60_vm1, %v40_v44 }
  0x2c   :  { %1139 = vmatmul.mubr.msk.f32.gmra.mrb[20].mxu0 %vm60_vm1, %v41_v46 }
  0x2d   :  { %1141 = vmatprep.mubr.msk.f32.mxu0 %vm60_vm1, %v42_v47 }
  0x30   :  { %1142 = vmatmul.mubr.msk.f32.gmra.mrb[22].mxu0 %vm60_vm1, %v43_v48 }
  0x31   :  { %1144 = vmatprep.mubr.msk.f32.mxu0 %vm60_vm1, %v44_v49 }
  0x34   :  { %1145 = vmatmul.mubr.msk.f32.gmra.mrb[24].mxu0 %vm60_vm1, %v45_v50 }
  0x35   :  { %1147 = vmatprep.mubr.msk.f32.mxu0 %vm60_vm1, %v46_v51 }
  0x38   :  { %1148 = vmatmul.mubr.msk.f32.gmra.mrb[26].mxu0 %vm60_vm1, %v47_v52 }
  0x39   :  { %1150 = vmatprep.mubr.msk.f32.mxu0 %vm60_vm1, %v48_v53 }
  0x3c   :  { %1151 = vmatmul.mubr.msk.f32.gmra.mrb[28].mxu0 %vm60_vm1, %v49_v54 }
  0x3d   :  { %1153 = vmatprep.mubr.msk.f32.mxu0 %vm60_vm1, %v50_v55 }
  0x40   :  { %1154 = vmatmul.mubr.msk.f32.gmra.mrb[30].mxu0 %vm60_vm1, %v51_v56 }
  0xd7   :  { %v1110_v58 = vpop.f32.mrb[0].mxu0 }
  0xd8   :  { %v233_v59 = vadd.f32 %v1110_v58, %v1624_v57  ;;  %v227_v60 = vpop.f32.mrb[1].mxu0 }
  0xd9   :  { %v228_v61 = vadd.f32 %v1624_v57, %v227_v60 }
  0xda   :  { %v387_v0 = vmax.f32 %v233_v59, 0.0 }
  0xdb   :  { %v386_v62 = vmax.f32 %v228_v61, 0.0  ;;  %v1113_v63 = vpop.f32.mrb[2].mxu0 }
  0xdc   :  { %v243_v1 = vadd.f32 %v1113_v63, %v1624_v57  ;;  %v237_v2 = vpop.f32.mrb[3].mxu0 }
  0xdd   :  { %v238_v3 = vadd.f32 %v1624_v57, %v237_v2  ;;  %1188 = vmatprep.mubr.f32.mxu0 %v386_v62 }
  0xde   :  { %1189 = vmatmul.mubr.f32.vlgmr.msra.gmra.mrb[32].mxu0 %v387_v0  ;;  %v389_v6 = vmax.f32 %v243_v1, 0.0 }
  0xdf   :  { %v388_v4 = vmax.f32 %v238_v3, 0.0  ;;  %v1116_v5 = vpop.f32.mrb[4].mxu0 }
  0xe0   :  { %v253_v7 = vadd.f32 %v1116_v5, %v1624_v57  ;;  %v247_v8 = vpop.f32.mrb[5].mxu0 }
  0xe1   :  { %v248_v9 = vadd.f32 %v1624_v57, %v247_v8  ;;  %1191 = vmatprep.mubr.f32.mxu0 %v388_v4 }
  0xe2   :  { %v391_v10 = vmax.f32 %v253_v7, 0.0  ;;  %1192 = vmatmul.mubr.f32.gmra.mrb[34].mxu0 %v389_v6 }
  0xe3   :  { %v390_v11 = vmax.f32 %v248_v9, 0.0  ;;  %v1119_v12 = vpop.f32.mrb[6].mxu0 }
  0xe4   :  { %v263_v13 = vadd.f32 %v1119_v12, %v1624_v57  ;;  %v257_v14 = vpop.f32.mrb[7].mxu0 }
  0xe5   :  { %1194 = vmatprep.mubr.f32.mxu0 %v390_v11  ;;  %v258_v15 = vadd.f32 %v1624_v57, %v257_v14 }
  0xe6   :  { %v393_v16 = vmax.f32 %v263_v13, 0.0  ;;  %1195 = vmatmul.mubr.f32.gmra.mrb[36].mxu0 %v391_v10 }
  0xe7   :  { %v1122_v17 = vpop.f32.mrb[8].mxu0  ;;  %v392_v18 = vmax.f32 %v258_v15, 0.0 }
  0xe8   :  { %v273_v19 = vadd.f32 %v1122_v17, %v1624_v57  ;;  %v267_v20 = vpop.f32.mrb[9].mxu0 }
  0xe9   :  { %v268_v21 = vadd.f32 %v1624_v57, %v267_v20  ;;  %1197 = vmatprep.mubr.f32.mxu1 %v392_v18 }
  0xea   :  { %v395_v22 = vmax.f32 %v273_v19, 0.0  ;;  %1198 = vmatmul.mubr.f32.vlgmr.msra.gmra.mrb[0].mxu1 %v393_v16 }
  0xeb   :  { %v394_v23 = vmax.f32 %v268_v21, 0.0  ;;  %v1125_v24 = vpop.f32.mrb[10].mxu0 }
  0xec   :  { %v283_v25 = vadd.f32 %v1125_v24, %v1624_v57  ;;  %v277_v26 = vpop.f32.mrb[11].mxu0 }
  0xed   :  { %v278_v27 = vadd.f32 %v1624_v57, %v277_v26  ;;  %1200 = vmatprep.mubr.f32.mxu1 %v394_v23 }
  0xee   :  { %v397_v28 = vmax.f32 %v283_v25, 0.0  ;;  %1201 = vmatmul.mubr.f32.gmra.mrb[2].mxu1 %v395_v22 }
  0xef   :  { %v396_v29 = vmax.f32 %v278_v27, 0.0  ;;  %v1128_v30 = vpop.f32.mrb[12].mxu0  ;;  %v1661_v27 = vld [vmem:[%s2051_s4] ss:$0 sm:$0xff] }
  0xf0   :  { %v293_v31 = vadd.f32 %v1128_v30, %v1624_v57  ;;  %v287_v32 = vpop.f32.mrb[13].mxu0 }
  0xf1   :  { %v288_v33 = vadd.f32 %v1624_v57, %v287_v32  ;;  %1203 = vmatprep.mubr.f32.mxu1 %v396_v29 }
  0xf2   :  { %v399_v34 = vmax.f32 %v293_v31, 0.0  ;;  %1204 = vmatmul.mubr.f32.gmra.mrb[4].mxu1 %v397_v28 }
  0xf3   :  { %v398_v35 = vmax.f32 %v288_v33, 0.0  ;;  %v1131_v36 = vpop.f32.mrb[14].mxu0 }
  0xf4   :  { %v303_v37 = vadd.f32 %v1131_v36, %v1624_v57  ;;  %v297_v38 = vpop.f32.mrb[15].mxu0 }
  0xf5   :  { %v298_v39 = vadd.f32 %v1624_v57, %v297_v38  ;;  %1206 = vmatprep.mubr.f32.mxu1 %v398_v35 }
  0xf6   :  { %v401_v40 = vmax.f32 %v303_v37, 0.0  ;;  %1207 = vmatmul.mubr.f32.gmra.mrb[6].mxu1 %v399_v34 }
  0xf7   :  { %v400_v41 = vmax.f32 %v298_v39, 0.0  ;;  %v1134_v42 = vpop.f32.mrb[16].mxu0 }
  0xf8   :  { %v313_v43 = vadd.f32 %v1134_v42, %v1624_v57  ;;  %v307_v44 = vpop.f32.mrb[17].mxu0 }
  0xf9   :  { %v308_v45 = vadd.f32 %v1624_v57, %v307_v44  ;;  %1209 = vmatprep.mubr.f32.mxu1 %v400_v41 }
  0xfa   :  { %v403_v46 = vmax.f32 %v313_v43, 0.0  ;;  %1210 = vmatmul.mubr.f32.gmra.mrb[8].mxu1 %v401_v40 }
  0xfb   :  { %v402_v47 = vmax.f32 %v308_v45, 0.0  ;;  %v1137_v48 = vpop.f32.mrb[18].mxu0 }
  0xfc   :  { %v323_v49 = vadd.f32 %v1137_v48, %v1624_v57  ;;  %v317_v50 = vpop.f32.mrb[19].mxu0 }
  0xfd   :  { %v318_v51 = vadd.f32 %v1624_v57, %v317_v50  ;;  %1212 = vmatprep.mubr.f32.mxu1 %v402_v47 }
  0xfe   :  { %v405_v52 = vmax.f32 %v323_v49, 0.0  ;;  %1213 = vmatmul.mubr.f32.gmra.mrb[10].mxu1 %v403_v46 }
  0xff   :  { %v404_v53 = vmax.f32 %v318_v51, 0.0  ;;  %v1140_v54 = vpop.f32.mrb[20].mxu0 }
 0x100   :  { %v333_v55 = vadd.f32 %v1140_v54, %v1624_v57  ;;  %v327_v56 = vpop.f32.mrb[21].mxu0 }
 0x101   :  { %v328_v58 = vadd.f32 %v1624_v57, %v327_v56  ;;  %1215 = vmatprep.mubr.f32.mxu1 %v404_v53 }
 0x102   :  { %v407_v59 = vmax.f32 %v333_v55, 0.0  ;;  %1216 = vmatmul.mubr.f32.gmra.mrb[12].mxu1 %v405_v52 }
 0x103   :  { %v406_v60 = vmax.f32 %v328_v58, 0.0  ;;  %v1143_v61 = vpop.f32.mrb[22].mxu0 }
 0x104   :  { %v343_v62 = vadd.f32 %v1143_v61, %v1624_v57  ;;  %v337_v63 = vpop.f32.mrb[23].mxu0 }
 0x105   :  { %v338_v0 = vadd.f32 %v1624_v57, %v337_v63  ;;  %1218 = vmatprep.mubr.f32.mxu1 %v406_v60 }
 0x106   :  { %v409_v1 = vmax.f32 %v343_v62, 0.0  ;;  %1219 = vmatmul.mubr.f32.gmra.mrb[14].mxu1 %v407_v59 }
 0x107   :  { %v408_v2 = vmax.f32 %v338_v0, 0.0  ;;  %v1146_v3 = vpop.f32.mrb[24].mxu0 }
 0x108   :  { %v353_v4 = vadd.f32 %v1146_v3, %v1624_v57  ;;  %v347_v5 = vpop.f32.mrb[25].mxu0 }
 0x109   :  { %v348_v6 = vadd.f32 %v1624_v57, %v347_v5  ;;  %1221 = vmatprep.mubr.f32.mxu1 %v408_v2 }
 0x10a   :  { %v411_v7 = vmax.f32 %v353_v4, 0.0  ;;  %1222 = vmatmul.mubr.f32.gmra.mrb[16].mxu1 %v409_v1 }
 0x10b   :  { %v410_v8 = vmax.f32 %v348_v6, 0.0  ;;  %v1149_v9 = vpop.f32.mrb[26].mxu0 }
 0x10c   :  { %v363_v10 = vadd.f32 %v1149_v9, %v1624_v57  ;;  %v357_v11 = vpop.f32.mrb[27].mxu0 }
 0x10d   :  { %v358_v12 = vadd.f32 %v1624_v57, %v357_v11  ;;  %1224 = vmatprep.mubr.f32.mxu1 %v410_v8 }
 0x10e   :  { %v413_v13 = vmax.f32 %v363_v10, 0.0  ;;  %1225 = vmatmul.mubr.f32.gmra.mrb[18].mxu1 %v411_v7 }
 0x10f   :  { %v412_v14 = vmax.f32 %v358_v12, 0.0  ;;  %v1152_v15 = vpop.f32.mrb[28].mxu0 }
 0x110   :  { %v373_v16 = vadd.f32 %v1152_v15, %v1624_v57  ;;  %v367_v17 = vpop.f32.mrb[29].mxu0 }
 0x111   :  { %v368_v18 = vadd.f32 %v1624_v57, %v367_v17  ;;  %1227 = vmatprep.mubr.f32.mxu1 %v412_v14 }
 0x112   :  { %v415_v19 = vmax.f32 %v373_v16, 0.0  ;;  %1228 = vmatmul.mubr.f32.gmra.mrb[20].mxu1 %v413_v13 }
 0x113   :  { %v414_v20 = vmax.f32 %v368_v18, 0.0  ;;  %v1155_v21 = vpop.f32.mrb[30].mxu0 }
 0x114   :  { %v383_v22 = vadd.f32 %v1155_v21, %v1624_v57  ;;  %v377_v23 = vpop.f32.mrb[31].mxu0 }
 0x115   :  { %v378_v24 = vadd.f32 %v1624_v57, %v377_v23  ;;  %1230 = vmatprep.mubr.f32.mxu1 %v414_v20 }
 0x116   :  { %v417_v25 = vmax.f32 %v383_v22, 0.0  ;;  %1231 = vmatmul.mubr.f32.gmra.mrb[22].mxu1 %v415_v19 }
 0x117   :  { %v416_v26 = vmax.f32 %v378_v24, 0.0 }
 0x119   :  { %1233 = vmatprep.mubr.f32.mxu1 %v416_v26 }
 0x11a   :  { %1234 = vmatmul.mubr.f32.gmra.mrb[24].mxu1 %v417_v25 }
 0x1b1   :  { %v1190_v28 = vpop.f32.mrb[32].mxu0 }
 0x1b2   :  { %v1664_v29 = vadd.f32 %v1190_v28, %v1661_v27  ;;  %v507_v30 = vpop.f32.mrb[33].mxu0 }
 0x1b3   :  { %v1668_v57 = vadd.f32 %v1661_v27, %v507_v30 }
 0x1b4   :  { %668 = vmax.xlane.f32.xlu0 %v1664_v29 }
 0x1b5   :  { %v1193_v31 = vpop.f32.mrb[34].mxu0 }
 0x1b6   :  { %v1671_v32 = vadd.f32 %v1193_v31, %v1661_v27  ;;  %v517_v33 = vpop.f32.mrb[35].mxu0 }
 0x1b7   :  { %v1676_v35 = vadd.f32 %v1661_v27, %v517_v33 }
 0x1b8   :  { %672 = vmax.xlane.f32.xlu1 %v1671_v32  ;;  %666 = vmax.xlane.f32.xlu0 %v1668_v57 }
 0x1b9   :  { %v1196_v34 = vpop.f32.mrb[36].mxu0 }
 0x1ba   :  { %v527_v36 = vpop.f32.mrb[37].mxu0  ;;  %v1684_v39 = vadd.f32 %v1196_v34, %v1661_v27 }
 0x1bb   :  { %v1679_v37 = vadd.f32 %v1661_v27, %v527_v36 }
 0x1bc   :  { %670 = vmax.xlane.f32.xlu1 %v1676_v35 }
 0x1bd   :  { %v1199_v38 = vpop.f32.mrb[0].mxu1  ;;  %674 = vmax.xlane.f32.xlu0 %v1679_v37 }
 0x1be   :  { %v537_v40 = vpop.f32.mrb[1].mxu1  ;;  %v1692_v43 = vadd.f32 %v1199_v38, %v1661_v27 }
 0x1bf   :  { %v1687_v41 = vadd.f32 %v1661_v27, %v537_v40 }
 0x1c0   :  { %676 = vmax.xlane.f32.xlu1 %v1684_v39 }
 0x1c1   :  { %v1202_v42 = vpop.f32.mrb[2].mxu1  ;;  %678 = vmax.xlane.f32.xlu0 %v1687_v41 }
 0x1c2   :  { %v547_v44 = vpop.f32.mrb[3].mxu1  ;;  %v1700_v47 = vadd.f32 %v1202_v42, %v1661_v27 }
 0x1c3   :  { %v1695_v45 = vadd.f32 %v1661_v27, %v547_v44 }
 0x1c4   :  { %680 = vmax.xlane.f32.xlu1 %v1692_v43 }
 0x1c5   :  { %v1205_v46 = vpop.f32.mrb[4].mxu1  ;;  %682 = vmax.xlane.f32.xlu0 %v1695_v45 }
 0x1c6   :  { %v557_v48 = vpop.f32.mrb[5].mxu1  ;;  %v1708_v51 = vadd.f32 %v1205_v46, %v1661_v27 }
 0x1c7   :  { %v1703_v49 = vadd.f32 %v1661_v27, %v557_v48 }
 0x1c8   :  { %684 = vmax.xlane.f32.xlu1 %v1700_v47 }
 0x1c9   :  { %v1208_v50 = vpop.f32.mrb[6].mxu1  ;;  %686 = vmax.xlane.f32.xlu0 %v1703_v49 }
 0x1ca   :  { %v567_v52 = vpop.f32.mrb[7].mxu1  ;;  %v1716_v55 = vadd.f32 %v1208_v50, %v1661_v27 }
 0x1cb   :  { %v1711_v53 = vadd.f32 %v1661_v27, %v567_v52 }
 0x1cc   :  { %688 = vmax.xlane.f32.xlu1 %v1708_v51 }
 0x1cd   :  { %v1211_v54 = vpop.f32.mrb[8].mxu1  ;;  %690 = vmax.xlane.f32.xlu0 %v1711_v53 }
 0x1ce   :  { %v577_v56 = vpop.f32.mrb[9].mxu1  ;;  %v1724_v60 = vadd.f32 %v1211_v54, %v1661_v27 }
 0x1cf   :  { %v1719_v58 = vadd.f32 %v1661_v27, %v577_v56 }
 0x1d0   :  { %692 = vmax.xlane.f32.xlu1 %v1716_v55 }
 0x1d1   :  { %v1214_v59 = vpop.f32.mrb[10].mxu1  ;;  %694 = vmax.xlane.f32.xlu0 %v1719_v58 }
 0x1d2   :  { %v587_v61 = vpop.f32.mrb[11].mxu1  ;;  %v1732_v0 = vadd.f32 %v1214_v59, %v1661_v27 }
 0x1d3   :  { %v1727_v62 = vadd.f32 %v1661_v27, %v587_v61 }
 0x1d4   :  { %696 = vmax.xlane.f32.xlu1 %v1724_v60 }
 0x1d5   :  { %v1217_v63 = vpop.f32.mrb[12].mxu1  ;;  %698 = vmax.xlane.f32.xlu0 %v1727_v62 }
 0x1d6   :  { %v597_v1 = vpop.f32.mrb[13].mxu1  ;;  %v1740_v4 = vadd.f32 %v1217_v63, %v1661_v27 }
 0x1d7   :  { %v1735_v2 = vadd.f32 %v1661_v27, %v597_v1 }
 0x1d8   :  { %700 = vmax.xlane.f32.xlu1 %v1732_v0 }
 0x1d9   :  { %v1220_v3 = vpop.f32.mrb[14].mxu1  ;;  %702 = vmax.xlane.f32.xlu0 %v1735_v2 }
 0x1da   :  { %v607_v5 = vpop.f32.mrb[15].mxu1  ;;  %v1748_v8 = vadd.f32 %v1220_v3, %v1661_v27 }
 0x1db   :  { %v1743_v6 = vadd.f32 %v1661_v27, %v607_v5 }
 0x1dc   :  { %704 = vmax.xlane.f32.xlu1 %v1740_v4 }
 0x1dd   :  { %v1223_v7 = vpop.f32.mrb[16].mxu1  ;;  %706 = vmax.xlane.f32.xlu0 %v1743_v6 }
 0x1de   :  { %v617_v9 = vpop.f32.mrb[17].mxu1  ;;  %v1756_v12 = vadd.f32 %v1223_v7, %v1661_v27 }
 0x1df   :  { %v1751_v10 = vadd.f32 %v1661_v27, %v617_v9 }
 0x1e0   :  { %708 = vmax.xlane.f32.xlu1 %v1748_v8 }
 0x1e1   :  { %v1226_v11 = vpop.f32.mrb[18].mxu1  ;;  %710 = vmax.xlane.f32.xlu0 %v1751_v10 }
 0x1e2   :  { %v627_v13 = vpop.f32.mrb[19].mxu1  ;;  %v1764_v16 = vadd.f32 %v1226_v11, %v1661_v27 }
 0x1e3   :  { %v1759_v14 = vadd.f32 %v1661_v27, %v627_v13 }
 0x1e4   :  { %712 = vmax.xlane.f32.xlu1 %v1756_v12 }
 0x1e5   :  { %v1229_v15 = vpop.f32.mrb[20].mxu1  ;;  %714 = vmax.xlane.f32.xlu0 %v1759_v14 }
 0x1e6   :  { %v637_v17 = vpop.f32.mrb[21].mxu1  ;;  %v1772_v20 = vadd.f32 %v1229_v15, %v1661_v27 }
 0x1e7   :  { %v1767_v18 = vadd.f32 %v1661_v27, %v637_v17 }
 0x1e8   :  { %716 = vmax.xlane.f32.xlu1 %v1764_v16 }
 0x1e9   :  { %v1232_v19 = vpop.f32.mrb[22].mxu1  ;;  %718 = vmax.xlane.f32.xlu0 %v1767_v18 }
 0x1ea   :  { %v647_v21 = vpop.f32.mrb[23].mxu1  ;;  %v1780_v24 = vadd.f32 %v1232_v19, %v1661_v27 }
 0x1eb   :  { %v1775_v22 = vadd.f32 %v1661_v27, %v647_v21 }
 0x1ec   :  { %720 = vmax.xlane.f32.xlu1 %v1772_v20 }
 0x1ed   :  { %v1235_v23 = vpop.f32.mrb[24].mxu1  ;;  %722 = vmax.xlane.f32.xlu0 %v1775_v22 }
 0x1ee   :  { %v1783_v25 = vadd.f32 %v1235_v23, %v1661_v27  ;;  %v657_v26 = vpop.f32.mrb[25].mxu1 }
 0x1ef   :  { %v1786_v28 = vadd.f32 %v1661_v27, %v657_v26 }
 0x1f0   :  { %724 = vmax.xlane.f32.xlu1 %v1780_v24 }
 0x1f1   :  { %726 = vmax.xlane.f32.xlu0 %v1786_v28 }
 0x1f4   :  { %728 = vmax.xlane.f32.xlu1 %v1783_v25 }
 0x241   :  { %v669_v30 = vpop.xlane.xlu0 %668 }
 0x242   :  { %v731_v31 = vsub.f32 %v1664_v29, %v669_v30 }
 0x244   :  { %v764_v33 = vmul.f32 1.442695, %v731_v31 }
 0x245   :  { %v673_v34 = vpop.xlane.xlu1 %672  ;;  %v667_v36 = vpop.xlane.xlu0 %666 }
 0x246   :  { %1284 = vpow2.f32 %v764_v33  ;;  %v733_v38 = vsub.f32 %v1671_v32, %v673_v34  ;;  %v730_v40 = vsub.f32 %v1668_v57, %v667_v36 }
 0x248   :  { %v768_v42 = vmul.f32 1.442695, %v733_v38  ;;  %v762_v27 = vmul.f32 1.442695, %v730_v40 }
 0x249   :  { %v671_v44 = vpop.xlane.xlu1 %670 }
 0x24a   :  { %1286 = vpow2.f32 %v768_v42  ;;  %v732_v46 = vsub.f32 %v1676_v35, %v671_v44  ;;  %v675_v48 = vpop.xlane.xlu0 %674 }
 0x24b   :  { %1288 = vpow2.f32 %v762_v27  ;;  %v734_v50 = vsub.f32 %v1679_v37, %v675_v48 }
 0x24c   :  { %v766_v52 = vmul.f32 1.442695, %v732_v46 }
 0x24d   :  { %v677_v29 = vpop.xlane.xlu1 %676  ;;  %v770_v59 = vmul.f32 1.442695, %v734_v50 }
 0x24e   :  { %1290 = vpow2.f32 %v766_v52  ;;  %v735_v54 = vsub.f32 %v1684_v39, %v677_v29  ;;  %v679_v56 = vpop.xlane.xlu0 %678 }
 0x24f   :  { %v736_v32 = vsub.f32 %v1687_v41, %v679_v56 }
 0x250   :  { %v1798_v57 = vpop.eup %1284  ;;  %v772_v61 = vmul.f32 1.442695, %v735_v54 }
 0x251   :  { %828 = vadd.xlane.f32.xlu1 %v1798_v57  ;;  %v681_v63 = vpop.xlane.xlu1 %680  ;;  %v774_v37 = vmul.f32 1.442695, %v736_v32 }
 0x252   :  { %1292 = vpow2.f32 %v772_v61  ;;  %v737_v35 = vsub.f32 %v1692_v43, %v681_v63  ;;  %v683_v1 = vpop.xlane.xlu0 %682 }
 0x253   :  { %1294 = vpow2.f32 %v770_v59  ;;  %v738_v3 = vsub.f32 %v1695_v45, %v683_v1 }
 0x254   :  { %v1803_v5 = vpop.eup %1286  ;;  %v776_v39 = vmul.f32 1.442695, %v737_v35 }
 0x255   :  { %v1805_v7 = vpop.eup %1288  ;;  %832 = vadd.xlane.f32.xlu1 %v1803_v5  ;;  %v685_v41 = vpop.xlane.xlu1 %684  ;;  %v778_v43 = vmul.f32 1.442695, %v738_v3 }
 0x256   :  { %1296 = vpow2.f32 %v776_v39  ;;  %v739_v9 = vsub.f32 %v1700_v47, %v685_v41  ;;  %826 = vadd.xlane.f32.xlu0 %v1805_v7  ;;  %v687_v11 = vpop.xlane.xlu0 %686 }
 0x257   :  { %1298 = vpow2.f32 %v774_v37  ;;  %v740_v13 = vsub.f32 %v1703_v49, %v687_v11 }
 0x258   :  { %v1811_v15 = vpop.eup %1290  ;;  %v780_v45 = vmul.f32 1.442695, %v739_v9 }
 0x259   :  { %v689_v17 = vpop.xlane.xlu1 %688  ;;  %v782_v23 = vmul.f32 1.442695, %v740_v13 }
 0x25a   :  { %1300 = vpow2.f32 %v780_v45  ;;  %v741_v19 = vsub.f32 %v1708_v51, %v689_v17  ;;  %830 = vadd.xlane.f32.xlu0 %v1811_v15  ;;  %v691_v21 = vpop.xlane.xlu0 %690 }
 0x25b   :  { %1302 = vpow2.f32 %v778_v43  ;;  %v742_v47 = vsub.f32 %v1711_v53, %v691_v21 }
 0x25c   :  { %v1816_v26 = vpop.eup %1292  ;;  %v784_v30 = vmul.f32 1.442695, %v741_v19 }
 0x25d   :  { %v1818_v31 = vpop.eup %1294  ;;  %836 = vadd.xlane.f32.xlu1 %v1816_v26  ;;  %v693_v49 = vpop.xlane.xlu1 %692  ;;  %v786_v34 = vmul.f32 1.442695, %v742_v47 }
 0x25e   :  { %1304 = vpow2.f32 %v784_v30  ;;  %v743_v33 = vsub.f32 %v1716_v55, %v693_v49  ;;  %834 = vadd.xlane.f32.xlu0 %v1818_v31  ;;  %v695_v51 = vpop.xlane.xlu0 %694 }
 0x25f   :  { %1306 = vpow2.f32 %v782_v23  ;;  %v744_v36 = vsub.f32 %v1719_v58, %v695_v51 }
 0x260   :  { %v1824_v38 = vpop.eup %1296  ;;  %v788_v53 = vmul.f32 1.442695, %v743_v33 }
 0x261   :  { %v1826_v40 = vpop.eup %1298  ;;  %840 = vadd.xlane.f32.xlu1 %v1824_v38  ;;  %v697_v42 = vpop.xlane.xlu1 %696  ;;  %v790_v44 = vmul.f32 1.442695, %v744_v36 }
 0x262   :  { %1308 = vpow2.f32 %v788_v53  ;;  %v745_v27 = vsub.f32 %v1724_v60, %v697_v42  ;;  %838 = vadd.xlane.f32.xlu0 %v1826_v40  ;;  %v699_v55 = vpop.xlane.xlu0 %698 }
 0x263   :  { %1310 = vpow2.f32 %v786_v34  ;;  %v746_v46 = vsub.f32 %v1727_v62, %v699_v55 }
 0x264   :  { %v1832_v48 = vpop.eup %1300  ;;  %v792_v58 = vmul.f32 1.442695, %v745_v27 }
 0x265   :  { %v1834_v50 = vpop.eup %1302  ;;  %844 = vadd.xlane.f32.xlu1 %v1832_v48  ;;  %v701_v52 = vpop.xlane.xlu1 %700  ;;  %v794_v54 = vmul.f32 1.442695, %v746_v46 }
 0x266   :  { %1312 = vpow2.f32 %v792_v58  ;;  %v747_v29 = vsub.f32 %v1732_v0, %v701_v52  ;;  %842 = vadd.xlane.f32.xlu0 %v1834_v50  ;;  %v703_v60 = vpop.xlane.xlu0 %702 }
 0x267   :  { %1314 = vpow2.f32 %v790_v44  ;;  %v748_v56 = vsub.f32 %v1735_v2, %v703_v60 }
 0x268   :  { %v1840_v59 = vpop.eup %1304  ;;  %v796_v62 = vmul.f32 1.442695, %v747_v29 }
 0x269   :  { %v1842_v32 = vpop.eup %1306  ;;  %848 = vadd.xlane.f32.xlu1 %v1840_v59  ;;  %v705_v61 = vpop.xlane.xlu1 %704  ;;  %v798_v35 = vmul.f32 1.442695, %v748_v56 }
 0x26a   :  { %1316 = vpow2.f32 %v796_v62  ;;  %v749_v63 = vsub.f32 %v1740_v4, %v705_v61  ;;  %846 = vadd.xlane.f32.xlu0 %v1842_v32  ;;  %v707_v0 = vpop.xlane.xlu0 %706 }
 0x26b   :  { %1318 = vpow2.f32 %v794_v54  ;;  %v750_v1 = vsub.f32 %v1743_v6, %v707_v0 }
 0x26c   :  { %v1848_v37 = vpop.eup %1308  ;;  %v800_v2 = vmul.f32 1.442695, %v749_v63 }
 0x26d   :  { %v1850_v3 = vpop.eup %1310  ;;  %852 = vadd.xlane.f32.xlu1 %v1848_v37  ;;  %v709_v39 = vpop.xlane.xlu1 %708  ;;  %v802_v9 = vmul.f32 1.442695, %v750_v1 }
 0x26e   :  { %1320 = vpow2.f32 %v800_v2  ;;  %v751_v41 = vsub.f32 %v1748_v8, %v709_v39  ;;  %850 = vadd.xlane.f32.xlu0 %v1850_v3  ;;  %v711_v4 = vpop.xlane.xlu0 %710 }
 0x26f   :  { %1322 = vpow2.f32 %v798_v35  ;;  %v752_v11 = vsub.f32 %v1751_v10, %v711_v4 }
 0x270   :  { %v1856_v43 = vpop.eup %1312  ;;  %v804_v6 = vmul.f32 1.442695, %v751_v41 }
 0x271   :  { %v1858_v13 = vpop.eup %1314  ;;  %856 = vadd.xlane.f32.xlu1 %v1856_v43  ;;  %v713_v45 = vpop.xlane.xlu1 %712  ;;  %v806_v19 = vmul.f32 1.442695, %v752_v11 }
 0x272   :  { %1324 = vpow2.f32 %v804_v6  ;;  %v753_v17 = vsub.f32 %v1756_v12, %v713_v45  ;;  %854 = vadd.xlane.f32.xlu0 %v1858_v13  ;;  %v715_v8 = vpop.xlane.xlu0 %714 }
 0x273   :  { %1326 = vpow2.f32 %v802_v9  ;;  %v754_v21 = vsub.f32 %v1759_v14, %v715_v8 }
 0x274   :  { %v1864_v23 = vpop.eup %1316  ;;  %v808_v10 = vmul.f32 1.442695, %v753_v17 }
 0x275   :  { %v1866_v47 = vpop.eup %1318  ;;  %860 = vadd.xlane.f32.xlu1 %v1864_v23  ;;  %v717_v30 = vpop.xlane.xlu1 %716  ;;  %v810_v33 = vmul.f32 1.442695, %v754_v21 }
 0x276   :  { %1328 = vpow2.f32 %v808_v10  ;;  %v755_v49 = vsub.f32 %v1764_v16, %v717_v30  ;;  %858 = vadd.xlane.f32.xlu0 %v1866_v47  ;;  %v719_v12 = vpop.xlane.xlu0 %718 }
 0x277   :  { %1330 = vpow2.f32 %v806_v19  ;;  %v756_v51 = vsub.f32 %v1767_v18, %v719_v12 }
 0x278   :  { %v1872_v34 = vpop.eup %1320  ;;  %v812_v14 = vmul.f32 1.442695, %v755_v49 }
 0x279   :  { %v1874_v36 = vpop.eup %1322  ;;  %864 = vadd.xlane.f32.xlu1 %v1872_v34  ;;  %v721_v53 = vpop.xlane.xlu1 %720  ;;  %v814_v27 = vmul.f32 1.442695, %v756_v51 }
 0x27a   :  { %1332 = vpow2.f32 %v812_v14  ;;  %v757_v42 = vsub.f32 %v1772_v20, %v721_v53  ;;  %862 = vadd.xlane.f32.xlu0 %v1874_v36  ;;  %v723_v16 = vpop.xlane.xlu0 %722 }
 0x27b   :  { %1334 = vpow2.f32 %v810_v33  ;;  %v758_v55 = vsub.f32 %v1775_v22, %v723_v16 }
 0x27c   :  { %v1880_v44 = vpop.eup %1324  ;;  %v816_v18 = vmul.f32 1.442695, %v757_v42 }
 0x27d   :  { %v1882_v46 = vpop.eup %1326  ;;  %868 = vadd.xlane.f32.xlu1 %v1880_v44  ;;  %v725_v58 = vpop.xlane.xlu1 %724  ;;  %v818_v29 = vmul.f32 1.442695, %v758_v55 }
 0x27e   :  { %1336 = vpow2.f32 %v816_v18  ;;  %v759_v52 = vsub.f32 %v1780_v24, %v725_v58  ;;  %866 = vadd.xlane.f32.xlu0 %v1882_v46  ;;  %v727_v20 = vpop.xlane.xlu0 %726 }
 0x27f   :  { %1338 = vpow2.f32 %v814_v27  ;;  %v760_v60 = vsub.f32 %v1786_v28, %v727_v20 }
 0x280   :  { %v1888_v54 = vpop.eup %1328  ;;  %v820_v22 = vmul.f32 1.442695, %v759_v52 }
 0x281   :  { %v1890_v56 = vpop.eup %1330  ;;  %872 = vadd.xlane.f32.xlu1 %v1888_v54  ;;  %v729_v62 = vpop.xlane.xlu1 %728  ;;  %v822_v24 = vmul.f32 1.442695, %v760_v60 }
 0x282   :  { %1340 = vpow2.f32 %v820_v22  ;;  %v761_v61 = vsub.f32 %v1783_v25, %v729_v62  ;;  %870 = vadd.xlane.f32.xlu0 %v1890_v56 }
 0x283   :  { %1342 = vpow2.f32 %v818_v29 }
 0x284   :  { %v1895_v63 = vpop.eup %1332  ;;  %v824_v0 = vmul.f32 1.442695, %v761_v61 }
 0x285   :  { %v1897_v35 = vpop.eup %1334  ;;  %876 = vadd.xlane.f32.xlu1 %v1895_v63 }
 0x286   :  { %1344 = vpow2.f32 %v824_v0  ;;  %874 = vadd.xlane.f32.xlu0 %v1897_v35 }
 0x287   :  { %1346 = vpow2.f32 %v822_v24 }
 0x288   :  { %v1901_v28 = vpop.eup %1336 }
 0x289   :  { %v1903_v1 = vpop.eup %1338  ;;  %880 = vadd.xlane.f32.xlu1 %v1901_v28 }
 0x28a   :  { %878 = vadd.xlane.f32.xlu0 %v1903_v1 }
 0x28c   :  { %v1907_v25 = vpop.eup %1340 }
 0x28d   :  { %v1909_v2 = vpop.eup %1342  ;;  %884 = vadd.xlane.f32.xlu1 %v1907_v25 }
 0x28e   :  { %882 = vadd.xlane.f32.xlu0 %v1909_v2 }
 0x290   :  { %v1913_v39 = vpop.eup %1344 }
 0x291   :  { %v1915_v41 = vpop.eup %1346  ;;  %888 = vadd.xlane.f32.xlu1 %v1913_v39 }
 0x292   :  { %886 = vadd.xlane.f32.xlu0 %v1915_v41 }
 0x2de   :  { %v829_v4 = vpop.xlane.xlu1 %828 }
 0x2df   :  { %1348 = vrcp.f32 %v829_v4 }
 0x2e2   :  { %v833_v9 = vpop.xlane.xlu1 %832 }
 0x2e3   :  { %1350 = vrcp.f32 %v833_v9  ;;  %v827_v11 = vpop.xlane.xlu0 %826 }
 0x2e4   :  { %1352 = vrcp.f32 %v827_v11 }
 0x2e7   :  { %v831_v6 = vpop.xlane.xlu0 %830 }
 0x2e8   :  { %1354 = vrcp.f32 %v831_v6 }
 0x2e9   :  { %v1349_v45 = vpop.eup %1348 }
 0x2ea   :  { %v893_v17 = vmul.f32 %v1349_v45, %v1798_v57  ;;  %v837_v8 = vpop.xlane.xlu1 %836 }
 0x2eb   :  { %1356 = vrcp.f32 %v837_v8  ;;  %v835_v19 = vpop.xlane.xlu0 %834 }
 0x2ec   :  { %955 = vst [vmem:[%s2052_s5 + $0x8] sm:$0xff] %v893_v17  ;;  %1358 = vrcp.f32 %v835_v19 }
 0x2ed   :  { %v1351_v21 = vpop.eup %1350 }
 0x2ee   :  { %v1353_v10 = vpop.eup %1352  ;;  %v897_v30 = vmul.f32 %v1351_v21, %v1803_v5  ;;  %v841_v49 = vpop.xlane.xlu1 %840 }
 0x2ef   :  { %v891_v12 = vmul.f32 %v1353_v10, %v1805_v7  ;;  %1360 = vrcp.f32 %v841_v49  ;;  %v839_v33 = vpop.xlane.xlu0 %838 }
 0x2f0   :  { %957 = vst [vmem:[%s2052_s5 + $0x18] sm:$0xff] %v897_v30  ;;  %1362 = vrcp.f32 %v839_v33 }
 0x2f1   :  { %954 = vst [vmem:[%s2052_s5] sm:$0xff] %v891_v12 }
 0x2f2   :  { %v1355_v57 = vpop.eup %1354  ;;  %v845_v51 = vpop.xlane.xlu1 %844 }
 0x2f3   :  { %v895_v14 = vmul.f32 %v1355_v57, %v1811_v15  ;;  %1364 = vrcp.f32 %v845_v51  ;;  %v843_v5 = vpop.xlane.xlu0 %842 }
 0x2f4   :  { %1366 = vrcp.f32 %v843_v5 }
 0x2f5   :  { %v1357_v53 = vpop.eup %1356  ;;  %956 = vst [vmem:[%s2052_s5 + $0x10] sm:$0xff] %v895_v14 }
 0x2f6   :  { %v1359_v7 = vpop.eup %1358  ;;  %v901_v42 = vmul.f32 %v1357_v53, %v1816_v26  ;;  %v849_v16 = vpop.xlane.xlu1 %848 }
 0x2f7   :  { %v899_v27 = vmul.f32 %v1359_v7, %v1818_v31  ;;  %1368 = vrcp.f32 %v849_v16  ;;  %v847_v55 = vpop.xlane.xlu0 %846 }
 0x2f8   :  { %959 = vst [vmem:[%s2052_s5 + $0x28] sm:$0xff] %v901_v42  ;;  %1370 = vrcp.f32 %v847_v55 }
 0x2f9   :  { %v1361_v15 = vpop.eup %1360  ;;  %958 = vst [vmem:[%s2052_s5 + $0x20] sm:$0xff] %v899_v27 }
 0x2fa   :  { %v1363_v18 = vpop.eup %1362  ;;  %v905_v58 = vmul.f32 %v1361_v15, %v1824_v38  ;;  %v853_v52 = vpop.xlane.xlu1 %852 }
 0x2fb   :  { %v903_v26 = vmul.f32 %v1363_v18, %v1826_v40  ;;  %1372 = vrcp.f32 %v853_v52  ;;  %v851_v31 = vpop.xlane.xlu0 %850 }
 0x2fc   :  { %961 = vst [vmem:[%s2052_s5 + $0x38] sm:$0xff] %v905_v58  ;;  %1374 = vrcp.f32 %v851_v31 }
 0x2fd   :  { %v1365_v20 = vpop.eup %1364  ;;  %960 = vst [vmem:[%s2052_s5 + $0x30] sm:$0xff] %v903_v26 }
 0x2fe   :  { %v1367_v29 = vpop.eup %1366  ;;  %v909_v60 = vmul.f32 %v1365_v20, %v1832_v48  ;;  %v857_v22 = vpop.xlane.xlu1 %856 }
 0x2ff   :  { %v907_v38 = vmul.f32 %v1367_v29, %v1834_v50  ;;  %1376 = vrcp.f32 %v857_v22  ;;  %v855_v40 = vpop.xlane.xlu0 %854 }
 0x300   :  { %963 = vst [vmem:[%s2052_s5 + $0x48] sm:$0xff] %v909_v60  ;;  %1378 = vrcp.f32 %v855_v40 }
 0x301   :  { %v1369_v62 = vpop.eup %1368  ;;  %962 = vst [vmem:[%s2052_s5 + $0x40] sm:$0xff] %v907_v38 }
 0x302   :  { %v1371_v61 = vpop.eup %1370  ;;  %v913_v24 = vmul.f32 %v1369_v62, %v1840_v59  ;;  %v861_v0 = vpop.xlane.xlu1 %860 }
 0x303   :  { %v911_v48 = vmul.f32 %v1371_v61, %v1842_v32  ;;  %1380 = vrcp.f32 %v861_v0  ;;  %v859_v50 = vpop.xlane.xlu0 %858 }
 0x304   :  { %965 = vst [vmem:[%s2052_s5 + $0x58] sm:$0xff] %v913_v24  ;;  %1382 = vrcp.f32 %v859_v50 }
 0x305   :  { %v1373_v4 = vpop.eup %1372  ;;  %964 = vst [vmem:[%s2052_s5 + $0x50] sm:$0xff] %v911_v48 }
 0x306   :  { %v1375_v9 = vpop.eup %1374  ;;  %v917_v11 = vmul.f32 %v1373_v4, %v1848_v37  ;;  %v865_v6 = vpop.xlane.xlu1 %864 }
 0x307   :  { %v915_v59 = vmul.f32 %v1375_v9, %v1850_v3  ;;  %1384 = vrcp.f32 %v865_v6  ;;  %v863_v32 = vpop.xlane.xlu0 %862 }
 0x308   :  { %967 = vst [vmem:[%s2052_s5 + $0x68] sm:$0xff] %v917_v11  ;;  %1386 = vrcp.f32 %v863_v32 }
 0x309   :  { %v1377_v45 = vpop.eup %1376  ;;  %966 = vst [vmem:[%s2052_s5 + $0x60] sm:$0xff] %v915_v59 }
 0x30a   :  { %v1379_v17 = vpop.eup %1378  ;;  %v921_v8 = vmul.f32 %v1377_v45, %v1856_v43  ;;  %v869_v19 = vpop.xlane.xlu1 %868 }
 0x30b   :  { %v919_v37 = vmul.f32 %v1379_v17, %v1858_v13  ;;  %1388 = vrcp.f32 %v869_v19  ;;  %v867_v3 = vpop.xlane.xlu0 %866 }
 0x30c   :  { %969 = vst [vmem:[%s2052_s5 + $0x78] sm:$0xff] %v921_v8  ;;  %1390 = vrcp.f32 %v867_v3 }
 0x30d   :  { %v1381_v21 = vpop.eup %1380  ;;  %968 = vst [vmem:[%s2052_s5 + $0x70] sm:$0xff] %v919_v37 }
 0x30e   :  { %v1383_v10 = vpop.eup %1382  ;;  %v925_v30 = vmul.f32 %v1381_v21, %v1864_v23  ;;  %v873_v49 = vpop.xlane.xlu1 %872 }
 0x30f   :  { %v923_v43 = vmul.f32 %v1383_v10, %v1866_v47  ;;  %1392 = vrcp.f32 %v873_v49  ;;  %v871_v13 = vpop.xlane.xlu0 %870 }
 0x310   :  { %971 = vst [vmem:[%s2052_s5 + $0x88] sm:$0xff] %v925_v30  ;;  %1394 = vrcp.f32 %v871_v13 }
 0x311   :  { %v1385_v12 = vpop.eup %1384  ;;  %970 = vst [vmem:[%s2052_s5 + $0x80] sm:$0xff] %v923_v43 }
 0x312   :  { %v1387_v33 = vpop.eup %1386  ;;  %v929_v57 = vmul.f32 %v1385_v12, %v1872_v34  ;;  %v877_v51 = vpop.xlane.xlu1 %876 }
 0x313   :  { %v927_v23 = vmul.f32 %v1387_v33, %v1874_v36  ;;  %1396 = vrcp.f32 %v877_v51  ;;  %v875_v47 = vpop.xlane.xlu0 %874 }
 0x314   :  { %973 = vst [vmem:[%s2052_s5 + $0x98] sm:$0xff] %v929_v57  ;;  %1398 = vrcp.f32 %v875_v47 }
 0x315   :  { %v1389_v14 = vpop.eup %1388  ;;  %972 = vst [vmem:[%s2052_s5 + $0x90] sm:$0xff] %v927_v23 }
 0x316   :  { %v1391_v5 = vpop.eup %1390  ;;  %v933_v53 = vmul.f32 %v1389_v14, %v1880_v44  ;;  %v881_v7 = vpop.xlane.xlu1 %880 }
 0x317   :  { %v931_v34 = vmul.f32 %v1391_v5, %v1882_v46  ;;  %1400 = vrcp.f32 %v881_v7  ;;  %v879_v36 = vpop.xlane.xlu0 %878 }
 0x318   :  { %975 = vst [vmem:[%s2052_s5 + $0xa8] sm:$0xff] %v933_v53  ;;  %1402 = vrcp.f32 %v879_v36 }
 0x319   :  { %v1393_v42 = vpop.eup %1392  ;;  %974 = vst [vmem:[%s2052_s5 + $0xa0] sm:$0xff] %v931_v34 }
 0x31a   :  { %v1395_v16 = vpop.eup %1394  ;;  %v937_v27 = vmul.f32 %v1393_v42, %v1888_v54  ;;  %v885_v55 = vpop.xlane.xlu1 %884 }
 0x31b   :  { %v935_v44 = vmul.f32 %v1395_v16, %v1890_v56  ;;  %1404 = vrcp.f32 %v885_v55  ;;  %v883_v46 = vpop.xlane.xlu0 %882 }
 0x31c   :  { %977 = vst [vmem:[%s2052_s5 + $0xb8] sm:$0xff] %v937_v27  ;;  %1406 = vrcp.f32 %v883_v46 }
 0x31d   :  { %v1397_v15 = vpop.eup %1396  ;;  %976 = vst [vmem:[%s2052_s5 + $0xb0] sm:$0xff] %v935_v44 }
 0x31e   :  { %v1399_v18 = vpop.eup %1398  ;;  %v941_v58 = vmul.f32 %v1397_v15, %v1895_v63  ;;  %v889_v52 = vpop.xlane.xlu1 %888 }
 0x31f   :  { %v939_v54 = vmul.f32 %v1399_v18, %v1897_v35  ;;  %1408 = vrcp.f32 %v889_v52  ;;  %v887_v56 = vpop.xlane.xlu0 %886 }
 0x320   :  { %979 = vst [vmem:[%s2052_s5 + $0xc8] sm:$0xff] %v941_v58  ;;  %1410 = vrcp.f32 %v887_v56 }
 0x321   :  { %v1401_v26 = vpop.eup %1400  ;;  %978 = vst [vmem:[%s2052_s5 + $0xc0] sm:$0xff] %v939_v54 }
 0x322   :  { %v1403_v31 = vpop.eup %1402  ;;  %v945_v20 = vmul.f32 %v1401_v26, %v1901_v28 }
 0x323   :  { %v943_v63 = vmul.f32 %v1403_v31, %v1903_v1 }
 0x324   :  { %981 = vst [vmem:[%s2052_s5 + $0xd8] sm:$0xff] %v945_v20 }
 0x325   :  { %v1405_v35 = vpop.eup %1404  ;;  %980 = vst [vmem:[%s2052_s5 + $0xd0] sm:$0xff] %v943_v63 }
 0x326   :  { %v1407_v29 = vpop.eup %1406  ;;  %v949_v60 = vmul.f32 %v1405_v35, %v1907_v25 }
 0x327   :  { %v947_v22 = vmul.f32 %v1407_v29, %v1909_v2 }
 0x328   :  { %983 = vst [vmem:[%s2052_s5 + $0xe8] sm:$0xff] %v949_v60 }
 0x329   :  { %v1409_v28 = vpop.eup %1408  ;;  %982 = vst [vmem:[%s2052_s5 + $0xe0] sm:$0xff] %v947_v22 }
 0x32a   :  { %v1411_v1 = vpop.eup %1410  ;;  %v953_v38 = vmul.f32 %v1409_v28, %v1913_v39 }
 0x32b   :  { %v951_v40 = vmul.f32 %v1411_v1, %v1915_v41 }
 0x32c   :  { %985 = vst [vmem:[%s2052_s5 + $0xf8] sm:$0xff] %v953_v38 }
 0x32d   :  { %984 = vst [vmem:[%s2052_s5 + $0xf0] sm:$0xff] %v951_v40 }

</bundles_post_ra>
